<compile_context>
chip_gen: v7x
topology: tpu7x:2x2x1
jax: 0.10.0
libtpu: 0.0.40
codegen_flags: <defaults>
</compile_context>

<pallas_src>
import jax
import jax.numpy as jnp
from jax.experimental import pallas as pl
from jax.experimental.pallas import tpu as pltpu


def _make_kernel(Bt, L, C_in, F, F2, OUT_pad):
    L2, L4 = L // 2, L // 4

    def kernel(x_ref, w1_ref, b1_ref, w2_ref, b2_ref, wfc_ref, bfc_ref,
               out_ref, taps1_ref, pool1_ref, taps2_ref, pool2_ref,
               q2_ref, flat_ref):

        def conv3_relu(h, seg, taps_ref, w_ref, b_ref):
            # Conv1d(k=3, padding=1) + ReLU on a (rows, chan) slab, where the
            # rows are Bt independent sequences of length `seg` stacked along
            # the sublane axis.  Logical output row r lives at buffer row r+1:
            #   lanes [0:c]   = h[r-1]   (zero at sequence starts)
            #   lanes [c:2c]  = h[r]
            #   lanes [2c:3c] = h[r+1]   (zero at sequence ends)
            # The +/-1 shifts are realized as sublane-offset stores into the
            # fused-tap buffer; boundary taps are zeroed with an iota mask.
            n, c = h.shape
            pos = jax.lax.broadcasted_iota(jnp.int32, (n, c), 0) % seg
            taps_ref[2:n + 2, 0:c] = jnp.where(pos == seg - 1, 0.0, h)
            taps_ref[1:2, 0:c] = jnp.zeros((1, c), jnp.float32)
            taps_ref[1:n + 1, c:2 * c] = h
            taps_ref[0:n, 2 * c:3 * c] = jnp.where(pos == 0, 0.0, h)
            taps_ref[n:n + 1, 2 * c:3 * c] = jnp.zeros((1, c), jnp.float32)
            # Single MXU matmul with K = 3*c (bf16 inputs, f32 accumulate).
            taps = taps_ref[1:n + 1, :].astype(w_ref.dtype)
            y = jnp.dot(taps, w_ref[...], preferred_element_type=jnp.float32)
            return jnp.maximum(y + b_ref[...], 0.0)

        def maxpool2(h, pool_ref):
            # MaxPool1d(kernel=2, stride=2): VPU max of even/odd rows read with
            # a stride-2 sublane slice (no selection matmuls).
            n = h.shape[0]
            pool_ref[...] = h
            even = pool_ref[pl.ds(0, n // 2, stride=2), :]
            odd = pool_ref[pl.ds(1, n // 2, stride=2), :]
            return jnp.maximum(even, odd)

        x = x_ref[...]                                        # (Bt*L,  C_in)
        h1 = conv3_relu(x, L, taps1_ref, w1_ref, b1_ref)      # (Bt*L,  F)
        q1 = maxpool2(h1, pool1_ref)                          # (Bt*L2, F)
        h2 = conv3_relu(q1, L2, taps2_ref, w2_ref, b2_ref)    # (Bt*L2, F2)
        q2 = maxpool2(h2, pool2_ref)                          # (Bt*L4, F2)

        # Flatten (position-major per element; fc weight permuted in the
        # wrapper to match PyTorch's channel-major Flatten), then ONE
        # (Bt, FLAT) @ (FLAT, OUT_pad) matmul instead of L4 tiny matmuls.
        q2_ref[...] = q2
        for j in range(L4):
            flat_ref[:, j * F2:(j + 1) * F2] = (
                q2_ref[pl.ds(j, Bt, stride=L4), :])
        acc = jnp.dot(flat_ref[...].astype(wfc_ref.dtype), wfc_ref[...],
                      preferred_element_type=jnp.float32)
        out_ref[...] = acc + bfc_ref[...]

    return kernel


def cnn_decoder_forward(x, params):
    """x: (B, L, input_dim) f32 -> (B, output_dim) f32 (== CNNDecoder.forward)."""
    W1, b1, W2, b2, Wfc, bfc = params
    B, L, C_in = x.shape
    F = W1.shape[0]
    F2 = W2.shape[0]
    OUT = Wfc.shape[0]
    assert L % 4 == 0, "two stride-2 pools require L % 4 == 0"
    L2, L4 = L // 2, L // 4
    FLAT = F2 * L4
    assert Wfc.shape[1] == FLAT, (Wfc.shape, FLAT)

    # Lane-dense output: pad output_dim to a multiple of 128, slice afterwards.
    OUT_pad = ((OUT + 127) // 128) * 128
    # Batch tile: amortize per-grid-step overhead; output block rows must be a
    # multiple of 8 or the full batch (pad B to a multiple of 8 for huge,
    # non-divisible batches).
    Bt = 8 if B % 8 == 0 else B
    G = B // Bt
    N, N2, N4 = Bt * L, Bt * L2, Bt * L4

    # ---- parameter re-layout (once, outside the kernel) ----
    # Conv weights: torch (C_out, C_in, 3) -> fused-tap (3*C_in, C_out), bf16.
    w1c = jnp.transpose(W1, (2, 1, 0)).reshape(3 * C_in, F).astype(jnp.bfloat16)
    w2c = jnp.transpose(W2, (2, 1, 0)).reshape(3 * F, F2).astype(jnp.bfloat16)
    b1r = b1.reshape(1, F).astype(jnp.float32)
    b2r = b2.reshape(1, F2).astype(jnp.float32)
    # torch flattens (B, F2, L4) channel-major (index c*L4 + l); the kernel is
    # position-major (index l*F2 + c), so permute, then zero-pad OUT -> OUT_pad.
    wfc_k = jnp.transpose(Wfc.reshape(OUT, F2, L4), (2, 1, 0)).reshape(FLAT, OUT)
    wfc_p = jnp.zeros((FLAT, OUT_pad), jnp.bfloat16)
    wfc_p = wfc_p.at[:, :OUT].set(wfc_k.astype(jnp.bfloat16))
    bfc_p = jnp.zeros((1, OUT_pad), jnp.float32).at[:, :OUT].set(
        bfc.reshape(1, OUT))

    x2d = x.reshape(B * L, C_in).astype(jnp.float32)

    kernel = _make_kernel(Bt, L, C_in, F, F2, OUT_pad)

    out = pl.pallas_call(
        kernel,
        out_shape=jax.ShapeDtypeStruct((B, OUT_pad), jnp.float32),
        grid_spec=pltpu.PrefetchScalarGridSpec(
            num_scalar_prefetch=0,
            grid=(G,),
            in_specs=[
                pl.BlockSpec((N, C_in), lambda i: (i, 0)),
                pl.BlockSpec(w1c.shape, lambda i: (0, 0)),
                pl.BlockSpec(b1r.shape, lambda i: (0, 0)),
                pl.BlockSpec(w2c.shape, lambda i: (0, 0)),
                pl.BlockSpec(b2r.shape, lambda i: (0, 0)),
                pl.BlockSpec(wfc_p.shape, lambda i: (0, 0)),
                pl.BlockSpec(bfc_p.shape, lambda i: (0, 0)),
            ],
            out_specs=pl.BlockSpec((Bt, OUT_pad), lambda i: (i, 0)),
            scratch_shapes=[
                pltpu.VMEM((N + 2, 3 * C_in), jnp.float32),   # conv1 taps
                pltpu.VMEM((N, F), jnp.float32),              # pool1 staging
                pltpu.VMEM((N2 + 2, 3 * F), jnp.float32),     # conv2 taps
                pltpu.VMEM((N2, F2), jnp.float32),            # pool2 staging
                pltpu.VMEM((N4, F2), jnp.float32),            # pooled features
                pltpu.VMEM((Bt, FLAT), jnp.float32),          # flattened fc in
            ],
        ),
        compiler_params=pltpu.CompilerParams(
            dimension_semantics=("parallel",),
            vmem_limit_bytes=48 * 1024 * 1024,
        ),
    )(x2d, w1c, b1r, w2c, b2r, wfc_p, bfc_p)
    return out[:, :OUT]


def reference_forward(x, params):
    """Pure-JAX/XLA f32 reference matching the PyTorch forward pass."""
    W1, b1, W2, b2, Wfc, bfc = params
    dn = ('NCH', 'OIH', 'NCH')
    hp = jax.lax.Precision.HIGHEST
    xc = jnp.transpose(x, (0, 2, 1))                            # NCL
    y1 = jax.lax.conv_general_dilated(xc, W1, (1,), [(1, 1)],
                                      dimension_numbers=dn, precision=hp)
    y1 = jnp.maximum(y1 + b1[None, :, None], 0.0)
    B, F, L = y1.shape
    q1 = y1.reshape(B, F, L // 2, 2).max(axis=-1)
    y2 = jax.lax.conv_general_dilated(q1, W2, (1,), [(1, 1)],
                                      dimension_numbers=dn, precision=hp)
    y2 = jnp.maximum(y2 + b2[None, :, None], 0.0)
    B, F2, L2 = y2.shape
    q2 = y2.reshape(B, F2, L2 // 2, 2).max(axis=-1)
    flat = q2.reshape(B, -1)
    return jnp.dot(flat, Wfc.T, precision=hp) + bfc


if __name__ == "__main__":
    # Small shapes consistent with the module: fc in_features must equal
    # (num_filters // 2) * (L // 4)  (== 6400 only at the original sizes).
    B, L, C_in = 2, 32, 16          # batch, seq length, input_dim
    F, OUT = 16, 8                  # num_filters, output_dim
    F2 = F // 2
    FLAT = F2 * (L // 4)            # 64 here (module hardcodes 6400)

    key = jax.random.PRNGKey(0)
    ks = jax.random.split(key, 7)
    x = jax.random.normal(ks[0], (B, L, C_in), jnp.float32)
    W1 = 0.1 * jax.random.normal(ks[1], (F, C_in, 3), jnp.float32)
    b1 = 0.1 * jax.random.normal(ks[2], (F,), jnp.float32)
    W2 = 0.1 * jax.random.normal(ks[3], (F2, F, 3), jnp.float32)
    b2 = 0.1 * jax.random.normal(ks[4], (F2,), jnp.float32)
    Wfc = 0.1 * jax.random.normal(ks[5], (OUT, FLAT), jnp.float32)
    bfc = 0.1 * jax.random.normal(ks[6], (OUT,), jnp.float32)
    params = (W1, b1, W2, b2, Wfc, bfc)

    out = jax.block_until_ready(cnn_decoder_forward(x, params))
    ref = jax.block_until_ready(reference_forward(x, params))

    assert out.shape == (B, OUT), out.shape
    # bf16 weights/activations on the MXU with f32 accumulation => small tol.
    if not jnp.allclose(out, ref, atol=2e-2, rtol=2e-2):
        raise AssertionError(
            f"mismatch vs reference: max abs err={jnp.max(jnp.abs(out - ref))}")
    print("KERNEL_OK")
</pallas_src>

<mosaic_0001>
module attributes {stable_mosaic.version = 11 : i64} {
  func.func @kernel(%arg0: i32, %arg1: memref<64x16xf32, #tpu.memory_space<vmem>>, %arg2: memref<48x16xbf16, #tpu.memory_space<vmem>>, %arg3: memref<1x16xf32, #tpu.memory_space<vmem>>, %arg4: memref<48x8xbf16, #tpu.memory_space<vmem>>, %arg5: memref<1x8xf32, #tpu.memory_space<vmem>>, %arg6: memref<64x128xbf16, #tpu.memory_space<vmem>>, %arg7: memref<1x128xf32, #tpu.memory_space<vmem>>, %arg8: memref<2x128xf32, #tpu.memory_space<vmem>>, %arg9: memref<66x48xf32, #tpu.memory_space<vmem>>, %arg10: memref<64x16xf32, #tpu.memory_space<vmem>>, %arg11: memref<34x48xf32, #tpu.memory_space<vmem>>, %arg12: memref<32x8xf32, #tpu.memory_space<vmem>>, %arg13: memref<16x8xf32, #tpu.memory_space<vmem>>, %arg14: memref<2x64xf32, #tpu.memory_space<vmem>>) attributes {dimension_semantics = [#tpu.dimension_semantics<parallel>], iteration_bounds = array<i64: 1>, scalar_prefetch = 0 : i64, scratch_operands = 6 : i64, tpu.core_type = #tpu.core_type<tc>, window_params = [{transform_indices = @transform_0, window_bounds = array<i64: 64, 16>}, {pipeline_mode = #tpu.pipeline_mode<synchronous>, transform_indices = @transform_1, window_bounds = array<i64: 48, 16>}, {pipeline_mode = #tpu.pipeline_mode<synchronous>, transform_indices = @transform_2, window_bounds = array<i64: 1, 16>}, {pipeline_mode = #tpu.pipeline_mode<synchronous>, transform_indices = @transform_3, window_bounds = array<i64: 48, 8>}, {pipeline_mode = #tpu.pipeline_mode<synchronous>, transform_indices = @transform_4, window_bounds = array<i64: 1, 8>}, {pipeline_mode = #tpu.pipeline_mode<synchronous>, transform_indices = @transform_5, window_bounds = array<i64: 64, 128>}, {pipeline_mode = #tpu.pipeline_mode<synchronous>, transform_indices = @transform_6, window_bounds = array<i64: 1, 128>}, {transform_indices = @transform_7, window_bounds = array<i64: 2, 128>}]} {
    %c0 = arith.constant 0 : index
    %c0_0 = arith.constant 0 : index
    %0 = vector.load %arg1[%c0, %c0_0] : memref<64x16xf32, #tpu.memory_space<vmem>>, vector<64x16xf32>
    %1 = tpu.iota {dimensions = array<i32: 0>} : vector<64x16xi32>
    %c32_i32 = arith.constant 32 : i32
    %c0_i32 = arith.constant 0 : i32
    %2 = arith.cmpi eq, %c32_i32, %c0_i32 : i32
    %c1_i32 = arith.constant 1 : i32
    %3 = arith.select %2, %c1_i32, %c32_i32 : i32
    %4 = vector.broadcast %3 : i32 to vector<64x16xi32>
    %5 = arith.remsi %1, %4 : vector<64x16xi32>
    %c0_i32_1 = arith.constant 0 : i32
    %6 = vector.broadcast %c0_i32_1 : i32 to vector<64x16xi32>
    %7 = arith.cmpi ne, %5, %6 : vector<64x16xi32>
    %c0_i32_2 = arith.constant 0 : i32
    %8 = vector.broadcast %c0_i32_2 : i32 to vector<64x16xi32>
    %9 = arith.cmpi slt, %5, %8 : vector<64x16xi32>
    %c0_i32_3 = arith.constant 0 : i32
    %10 = arith.cmpi slt, %3, %c0_i32_3 : i32
    %11 = vector.broadcast %10 : i1 to vector<64x16xi1>
    %12 = vector.broadcast %11 : vector<64x16xi1> to vector<64x16xi1>
    %13 = arith.xori %9, %12 : vector<64x16xi1>
    %14 = arith.andi %13, %7 : vector<64x16xi1>
    %15 = vector.broadcast %3 : i32 to vector<64x16xi32>
    %16 = arith.addi %5, %15 : vector<64x16xi32>
    %17 = arith.select %14, %16, %5 : vector<64x16xi1>, vector<64x16xi32>
    %c31_i32 = arith.constant 31 : i32
    %18 = vector.broadcast %c31_i32 : i32 to vector<64x16xi32>
    %19 = arith.cmpi eq, %17, %18 : vector<64x16xi32>
    %cst = arith.constant 0.000000e+00 : f32
    %20 = vector.broadcast %cst : f32 to vector<64x16xf32>
    %21 = arith.select %19, %20, %0 : vector<64x16xi1>, vector<64x16xf32>
    %c2 = arith.constant 2 : index
    %c0_4 = arith.constant 0 : index
    %22 = vector.load %arg9[%c2, %c0_4] : memref<66x48xf32, #tpu.memory_space<vmem>>, vector<64x16xf32>
    tpu.vector_store %arg9[%c2, %c0_4], %21 {strides = array<i32>} : memref<66x48xf32, #tpu.memory_space<vmem>>, vector<64x16xf32>,
    %cst_5 = arith.constant 0.000000e+00 : f32
    %23 = vector.broadcast %cst_5 : f32 to vector<1x16xf32>
    %c1 = arith.constant 1 : index
    %c0_6 = arith.constant 0 : index
    %24 = vector.load %arg9[%c1, %c0_6] : memref<66x48xf32, #tpu.memory_space<vmem>>, vector<1x16xf32>
    tpu.vector_store %arg9[%c1, %c0_6], %23 {strides = array<i32>} : memref<66x48xf32, #tpu.memory_space<vmem>>, vector<1x16xf32>,
    %c1_7 = arith.constant 1 : index
    %c16 = arith.constant 16 : index
    %25 = vector.load %arg9[%c1_7, %c16] : memref<66x48xf32, #tpu.memory_space<vmem>>, vector<64x16xf32>
    tpu.vector_store %arg9[%c1_7, %c16], %0 {strides = array<i32>} : memref<66x48xf32, #tpu.memory_space<vmem>>, vector<64x16xf32>,
    %c0_i32_8 = arith.constant 0 : i32
    %26 = vector.broadcast %c0_i32_8 : i32 to vector<64x16xi32>
    %27 = arith.cmpi eq, %17, %26 : vector<64x16xi32>
    %cst_9 = arith.constant 0.000000e+00 : f32
    %28 = vector.broadcast %cst_9 : f32 to vector<64x16xf32>
    %29 = arith.select %27, %28, %0 : vector<64x16xi1>, vector<64x16xf32>
    %c0_10 = arith.constant 0 : index
    %c32 = arith.constant 32 : index
    %30 = vector.load %arg9[%c0_10, %c32] : memref<66x48xf32, #tpu.memory_space<vmem>>, vector<64x16xf32>
    tpu.vector_store %arg9[%c0_10, %c32], %29 {strides = array<i32>} : memref<66x48xf32, #tpu.memory_space<vmem>>, vector<64x16xf32>,
    %cst_11 = arith.constant 0.000000e+00 : f32
    %31 = vector.broadcast %cst_11 : f32 to vector<1x16xf32>
    %c64 = arith.constant 64 : index
    %c32_12 = arith.constant 32 : index
    %32 = vector.load %arg9[%c64, %c32_12] : memref<66x48xf32, #tpu.memory_space<vmem>>, vector<1x16xf32>
    tpu.vector_store %arg9[%c64, %c32_12], %31 {strides = array<i32>} : memref<66x48xf32, #tpu.memory_space<vmem>>, vector<1x16xf32>,
    %c1_13 = arith.constant 1 : index
    %c0_14 = arith.constant 0 : index
    %33 = vector.load %arg9[%c1_13, %c0_14] : memref<66x48xf32, #tpu.memory_space<vmem>>, vector<64x48xf32>
    %34 = arith.truncf %33 : vector<64x48xf32> to vector<64x48xbf16>
    %c0_15 = arith.constant 0 : index
    %c0_16 = arith.constant 0 : index
    %35 = vector.load %arg2[%c0_15, %c0_16] : memref<48x16xbf16, #tpu.memory_space<vmem>>, vector<48x16xbf16>
    %cst_17 = arith.constant dense<0.000000e+00> : vector<64x16xf32>
    %36 = tpu.matmul %34, %35, %cst_17 {dimension_numbers = #tpu.dot_dimension_numbers<[1], [0], [0], [1], [0, 0, 1, 1], [], []>} : vector<64x48xbf16>, vector<48x16xbf16>, vector<64x16xf32> -> vector<64x16xf32>
    %c0_18 = arith.constant 0 : index
    %c0_19 = arith.constant 0 : index
    %37 = vector.load %arg3[%c0_18, %c0_19] : memref<1x16xf32, #tpu.memory_space<vmem>>, vector<1x16xf32>
    %38 = vector.broadcast %37 : vector<1x16xf32> to vector<64x16xf32>
    %39 = arith.addf %36, %38 : vector<64x16xf32>
    %cst_20 = arith.constant 0.000000e+00 : f32
    %40 = vector.broadcast %cst_20 : f32 to vector<64x16xf32>
    %41 = arith.maximumf %39, %40 : vector<64x16xf32>
    %c0_21 = arith.constant 0 : index
    %c0_22 = arith.constant 0 : index
    %42 = vector.load %arg10[%c0_21, %c0_22] : memref<64x16xf32, #tpu.memory_space<vmem>>, vector<64x16xf32>
    tpu.vector_store %arg10[%c0_21, %c0_22], %41 {strides = array<i32>} : memref<64x16xf32, #tpu.memory_space<vmem>>, vector<64x16xf32>,
    %c0_23 = arith.constant 0 : index
    %c0_24 = arith.constant 0 : index
    %43 = tpu.strided_load %arg10[%c0_23, %c0_24] {strides = array<i32: 2, 1>} : memref<64x16xf32, #tpu.memory_space<vmem>>, vector<32x16xf32>
    %c1_25 = arith.constant 1 : index
    %c0_26 = arith.constant 0 : index
    %44 = tpu.strided_load %arg10[%c1_25, %c0_26] {strides = array<i32: 2, 1>} : memref<64x16xf32, #tpu.memory_space<vmem>>, vector<32x16xf32>
    %45 = arith.maximumf %43, %44 : vector<32x16xf32>
    %46 = tpu.iota {dimensions = array<i32: 0>} : vector<32x16xi32>
    %c16_i32 = arith.constant 16 : i32
    %c0_i32_27 = arith.constant 0 : i32
    %47 = arith.cmpi eq, %c16_i32, %c0_i32_27 : i32
    %c1_i32_28 = arith.constant 1 : i32
    %48 = arith.select %47, %c1_i32_28, %c16_i32 : i32
    %49 = vector.broadcast %48 : i32 to vector<32x16xi32>
    %50 = arith.remsi %46, %49 : vector<32x16xi32>
    %c0_i32_29 = arith.constant 0 : i32
    %51 = vector.broadcast %c0_i32_29 : i32 to vector<32x16xi32>
    %52 = arith.cmpi ne, %50, %51 : vector<32x16xi32>
    %c0_i32_30 = arith.constant 0 : i32
    %53 = vector.broadcast %c0_i32_30 : i32 to vector<32x16xi32>
    %54 = arith.cmpi slt, %50, %53 : vector<32x16xi32>
    %c0_i32_31 = arith.constant 0 : i32
    %55 = arith.cmpi slt, %48, %c0_i32_31 : i32
    %56 = vector.broadcast %55 : i1 to vector<32x16xi1>
    %57 = vector.broadcast %56 : vector<32x16xi1> to vector<32x16xi1>
    %58 = arith.xori %54, %57 : vector<32x16xi1>
    %59 = arith.andi %58, %52 : vector<32x16xi1>
    %60 = vector.broadcast %48 : i32 to vector<32x16xi32>
    %61 = arith.addi %50, %60 : vector<32x16xi32>
    %62 = arith.select %59, %61, %50 : vector<32x16xi1>, vector<32x16xi32>
    %c15_i32 = arith.constant 15 : i32
    %63 = vector.broadcast %c15_i32 : i32 to vector<32x16xi32>
    %64 = arith.cmpi eq, %62, %63 : vector<32x16xi32>
    %cst_32 = arith.constant 0.000000e+00 : f32
    %65 = vector.broadcast %cst_32 : f32 to vector<32x16xf32>
    %66 = arith.select %64, %65, %45 : vector<32x16xi1>, vector<32x16xf32>
    %c2_33 = arith.constant 2 : index
    %c0_34 = arith.constant 0 : index
    %67 = vector.load %arg11[%c2_33, %c0_34] : memref<34x48xf32, #tpu.memory_space<vmem>>, vector<32x16xf32>
    tpu.vector_store %arg11[%c2_33, %c0_34], %66 {strides = array<i32>} : memref<34x48xf32, #tpu.memory_space<vmem>>, vector<32x16xf32>,
    %cst_35 = arith.constant 0.000000e+00 : f32
    %68 = vector.broadcast %cst_35 : f32 to vector<1x16xf32>
    %c1_36 = arith.constant 1 : index
    %c0_37 = arith.constant 0 : index
    %69 = vector.load %arg11[%c1_36, %c0_37] : memref<34x48xf32, #tpu.memory_space<vmem>>, vector<1x16xf32>
    tpu.vector_store %arg11[%c1_36, %c0_37], %68 {strides = array<i32>} : memref<34x48xf32, #tpu.memory_space<vmem>>, vector<1x16xf32>,
    %c1_38 = arith.constant 1 : index
    %c16_39 = arith.constant 16 : index
    %70 = vector.load %arg11[%c1_38, %c16_39] : memref<34x48xf32, #tpu.memory_space<vmem>>, vector<32x16xf32>
    tpu.vector_store %arg11[%c1_38, %c16_39], %45 {strides = array<i32>} : memref<34x48xf32, #tpu.memory_space<vmem>>, vector<32x16xf32>,
    %c0_i32_40 = arith.constant 0 : i32
    %71 = vector.broadcast %c0_i32_40 : i32 to vector<32x16xi32>
    %72 = arith.cmpi eq, %62, %71 : vector<32x16xi32>
    %cst_41 = arith.constant 0.000000e+00 : f32
    %73 = vector.broadcast %cst_41 : f32 to vector<32x16xf32>
    %74 = arith.select %72, %73, %45 : vector<32x16xi1>, vector<32x16xf32>
    %c0_42 = arith.constant 0 : index
    %c32_43 = arith.constant 32 : index
    %75 = vector.load %arg11[%c0_42, %c32_43] : memref<34x48xf32, #tpu.memory_space<vmem>>, vector<32x16xf32>
    tpu.vector_store %arg11[%c0_42, %c32_43], %74 {strides = array<i32>} : memref<34x48xf32, #tpu.memory_space<vmem>>, vector<32x16xf32>,
    %cst_44 = arith.constant 0.000000e+00 : f32
    %76 = vector.broadcast %cst_44 : f32 to vector<1x16xf32>
    %c32_45 = arith.constant 32 : index
    %c32_46 = arith.constant 32 : index
    %77 = vector.load %arg11[%c32_45, %c32_46] : memref<34x48xf32, #tpu.memory_space<vmem>>, vector<1x16xf32>
    tpu.vector_store %arg11[%c32_45, %c32_46], %76 {strides = array<i32>} : memref<34x48xf32, #tpu.memory_space<vmem>>, vector<1x16xf32>,
    %c1_47 = arith.constant 1 : index
    %c0_48 = arith.constant 0 : index
    %78 = vector.load %arg11[%c1_47, %c0_48] : memref<34x48xf32, #tpu.memory_space<vmem>>, vector<32x48xf32>
    %79 = arith.truncf %78 : vector<32x48xf32> to vector<32x48xbf16>
    %c0_49 = arith.constant 0 : index
    %c0_50 = arith.constant 0 : index
    %80 = vector.load %arg4[%c0_49, %c0_50] : memref<48x8xbf16, #tpu.memory_space<vmem>>, vector<48x8xbf16>
    %cst_51 = arith.constant dense<0.000000e+00> : vector<32x8xf32>
    %81 = tpu.matmul %79, %80, %cst_51 {dimension_numbers = #tpu.dot_dimension_numbers<[1], [0], [0], [1], [0, 0, 1, 1], [], []>} : vector<32x48xbf16>, vector<48x8xbf16>, vector<32x8xf32> -> vector<32x8xf32>
    %c0_52 = arith.constant 0 : index
    %c0_53 = arith.constant 0 : index
    %82 = vector.load %arg5[%c0_52, %c0_53] : memref<1x8xf32, #tpu.memory_space<vmem>>, vector<1x8xf32>
    %83 = vector.broadcast %82 : vector<1x8xf32> to vector<32x8xf32>
    %84 = arith.addf %81, %83 : vector<32x8xf32>
    %cst_54 = arith.constant 0.000000e+00 : f32
    %85 = vector.broadcast %cst_54 : f32 to vector<32x8xf32>
    %86 = arith.maximumf %84, %85 : vector<32x8xf32>
    %c0_55 = arith.constant 0 : index
    %c0_56 = arith.constant 0 : index
    %87 = vector.load %arg12[%c0_55, %c0_56] : memref<32x8xf32, #tpu.memory_space<vmem>>, vector<32x8xf32>
    tpu.vector_store %arg12[%c0_55, %c0_56], %86 {strides = array<i32>} : memref<32x8xf32, #tpu.memory_space<vmem>>, vector<32x8xf32>,
    %c0_57 = arith.constant 0 : index
    %c0_58 = arith.constant 0 : index
    %88 = tpu.strided_load %arg12[%c0_57, %c0_58] {strides = array<i32: 2, 1>} : memref<32x8xf32, #tpu.memory_space<vmem>>, vector<16x8xf32>
    %c1_59 = arith.constant 1 : index
    %c0_60 = arith.constant 0 : index
    %89 = tpu.strided_load %arg12[%c1_59, %c0_60] {strides = array<i32: 2, 1>} : memref<32x8xf32, #tpu.memory_space<vmem>>, vector<16x8xf32>
    %90 = arith.maximumf %88, %89 : vector<16x8xf32>
    %c0_61 = arith.constant 0 : index
    %c0_62 = arith.constant 0 : index
    %91 = vector.load %arg13[%c0_61, %c0_62] : memref<16x8xf32, #tpu.memory_space<vmem>>, vector<16x8xf32>
    tpu.vector_store %arg13[%c0_61, %c0_62], %90 {strides = array<i32>} : memref<16x8xf32, #tpu.memory_space<vmem>>, vector<16x8xf32>,
    %c0_63 = arith.constant 0 : index
    %c0_64 = arith.constant 0 : index
    %92 = tpu.strided_load %arg13[%c0_63, %c0_64] {strides = array<i32: 8, 1>} : memref<16x8xf32, #tpu.memory_space<vmem>>, vector<2x8xf32>
    %c0_65 = arith.constant 0 : index
    %c0_66 = arith.constant 0 : index
    %93 = vector.load %arg14[%c0_65, %c0_66] : memref<2x64xf32, #tpu.memory_space<vmem>>, vector<2x8xf32>
    tpu.vector_store %arg14[%c0_65, %c0_66], %92 {strides = array<i32>} : memref<2x64xf32, #tpu.memory_space<vmem>>, vector<2x8xf32>,
    %c1_67 = arith.constant 1 : index
    %c0_68 = arith.constant 0 : index
    %94 = tpu.strided_load %arg13[%c1_67, %c0_68] {strides = array<i32: 8, 1>} : memref<16x8xf32, #tpu.memory_space<vmem>>, vector<2x8xf32>
    %c0_69 = arith.constant 0 : index
    %c8 = arith.constant 8 : index
    %95 = vector.load %arg14[%c0_69, %c8] : memref<2x64xf32, #tpu.memory_space<vmem>>, vector<2x8xf32>
    tpu.vector_store %arg14[%c0_69, %c8], %94 {strides = array<i32>} : memref<2x64xf32, #tpu.memory_space<vmem>>, vector<2x8xf32>,
    %c2_70 = arith.constant 2 : index
    %c0_71 = arith.constant 0 : index
    %96 = tpu.strided_load %arg13[%c2_70, %c0_71] {strides = array<i32: 8, 1>} : memref<16x8xf32, #tpu.memory_space<vmem>>, vector<2x8xf32>
    %c0_72 = arith.constant 0 : index
    %c16_73 = arith.constant 16 : index
    %97 = vector.load %arg14[%c0_72, %c16_73] : memref<2x64xf32, #tpu.memory_space<vmem>>, vector<2x8xf32>
    tpu.vector_store %arg14[%c0_72, %c16_73], %96 {strides = array<i32>} : memref<2x64xf32, #tpu.memory_space<vmem>>, vector<2x8xf32>,
    %c3 = arith.constant 3 : index
    %c0_74 = arith.constant 0 : index
    %98 = tpu.strided_load %arg13[%c3, %c0_74] {strides = array<i32: 8, 1>} : memref<16x8xf32, #tpu.memory_space<vmem>>, vector<2x8xf32>
    %c0_75 = arith.constant 0 : index
    %c24 = arith.constant 24 : index
    %99 = vector.load %arg14[%c0_75, %c24] : memref<2x64xf32, #tpu.memory_space<vmem>>, vector<2x8xf32>
    tpu.vector_store %arg14[%c0_75, %c24], %98 {strides = array<i32>} : memref<2x64xf32, #tpu.memory_space<vmem>>, vector<2x8xf32>,
    %c4 = arith.constant 4 : index
    %c0_76 = arith.constant 0 : index
    %100 = tpu.strided_load %arg13[%c4, %c0_76] {strides = array<i32: 8, 1>} : memref<16x8xf32, #tpu.memory_space<vmem>>, vector<2x8xf32>
    %c0_77 = arith.constant 0 : index
    %c32_78 = arith.constant 32 : index
    %101 = vector.load %arg14[%c0_77, %c32_78] : memref<2x64xf32, #tpu.memory_space<vmem>>, vector<2x8xf32>
    tpu.vector_store %arg14[%c0_77, %c32_78], %100 {strides = array<i32>} : memref<2x64xf32, #tpu.memory_space<vmem>>, vector<2x8xf32>,
    %c5 = arith.constant 5 : index
    %c0_79 = arith.constant 0 : index
    %102 = tpu.strided_load %arg13[%c5, %c0_79] {strides = array<i32: 8, 1>} : memref<16x8xf32, #tpu.memory_space<vmem>>, vector<2x8xf32>
    %c0_80 = arith.constant 0 : index
    %c40 = arith.constant 40 : index
    %103 = vector.load %arg14[%c0_80, %c40] : memref<2x64xf32, #tpu.memory_space<vmem>>, vector<2x8xf32>
    tpu.vector_store %arg14[%c0_80, %c40], %102 {strides = array<i32>} : memref<2x64xf32, #tpu.memory_space<vmem>>, vector<2x8xf32>,
    %c6 = arith.constant 6 : index
    %c0_81 = arith.constant 0 : index
    %104 = tpu.strided_load %arg13[%c6, %c0_81] {strides = array<i32: 8, 1>} : memref<16x8xf32, #tpu.memory_space<vmem>>, vector<2x8xf32>
    %c0_82 = arith.constant 0 : index
    %c48 = arith.constant 48 : index
    %105 = vector.load %arg14[%c0_82, %c48] : memref<2x64xf32, #tpu.memory_space<vmem>>, vector<2x8xf32>
    tpu.vector_store %arg14[%c0_82, %c48], %104 {strides = array<i32>} : memref<2x64xf32, #tpu.memory_space<vmem>>, vector<2x8xf32>,
    %c7 = arith.constant 7 : index
    %c0_83 = arith.constant 0 : index
    %106 = tpu.strided_load %arg13[%c7, %c0_83] {strides = array<i32: 8, 1>} : memref<16x8xf32, #tpu.memory_space<vmem>>, vector<2x8xf32>
    %c0_84 = arith.constant 0 : index
    %c56 = arith.constant 56 : index
    %107 = vector.load %arg14[%c0_84, %c56] : memref<2x64xf32, #tpu.memory_space<vmem>>, vector<2x8xf32>
    tpu.vector_store %arg14[%c0_84, %c56], %106 {strides = array<i32>} : memref<2x64xf32, #tpu.memory_space<vmem>>, vector<2x8xf32>,
    %c0_85 = arith.constant 0 : index
    %c0_86 = arith.constant 0 : index
    %108 = vector.load %arg14[%c0_85, %c0_86] : memref<2x64xf32, #tpu.memory_space<vmem>>, vector<2x64xf32>
    %109 = arith.truncf %108 : vector<2x64xf32> to vector<2x64xbf16>
    %c0_87 = arith.constant 0 : index
    %c0_88 = arith.constant 0 : index
    %110 = vector.load %arg6[%c0_87, %c0_88] : memref<64x128xbf16, #tpu.memory_space<vmem>>, vector<64x128xbf16>
    %cst_89 = arith.constant dense<0.000000e+00> : vector<2x128xf32>
    %111 = tpu.matmul %109, %110, %cst_89 {dimension_numbers = #tpu.dot_dimension_numbers<[1], [0], [0], [1], [0, 0, 1, 1], [], []>} : vector<2x64xbf16>, vector<64x128xbf16>, vector<2x128xf32> -> vector<2x128xf32>
    %c0_90 = arith.constant 0 : index
    %c0_91 = arith.constant 0 : index
    %112 = vector.load %arg7[%c0_90, %c0_91] : memref<1x128xf32, #tpu.memory_space<vmem>>, vector<1x128xf32>
    %113 = vector.broadcast %112 : vector<1x128xf32> to vector<2x128xf32>
    %114 = arith.addf %111, %113 : vector<2x128xf32>
    %c0_92 = arith.constant 0 : index
    %c0_93 = arith.constant 0 : index
    %115 = vector.load %arg8[%c0_92, %c0_93] : memref<2x128xf32, #tpu.memory_space<vmem>>, vector<2x128xf32>
    tpu.vector_store %arg8[%c0_92, %c0_93], %114 {strides = array<i32>} : memref<2x128xf32, #tpu.memory_space<vmem>>, vector<2x128xf32>,
    return
  }
  func.func @transform_0(%arg0: i32) -> (i32, i32) {
    %c0_i32 = arith.constant 0 : i32
    %c0_i32_0 = arith.constant 0 : i32
    return %arg0, %c0_i32 : i32, i32
  }
  func.func @transform_1(%arg0: i32) -> (i32, i32) {
    %c0_i32 = arith.constant 0 : i32
    %c0_i32_0 = arith.constant 0 : i32
    %c0_i32_1 = arith.constant 0 : i32
    return %c0_i32, %c0_i32_0 : i32, i32
  }
  func.func @transform_2(%arg0: i32) -> (i32, i32) {
    %c0_i32 = arith.constant 0 : i32
    %c0_i32_0 = arith.constant 0 : i32
    %c0_i32_1 = arith.constant 0 : i32
    return %c0_i32, %c0_i32_0 : i32, i32
  }
  func.func @transform_3(%arg0: i32) -> (i32, i32) {
    %c0_i32 = arith.constant 0 : i32
    %c0_i32_0 = arith.constant 0 : i32
    %c0_i32_1 = arith.constant 0 : i32
    return %c0_i32, %c0_i32_0 : i32, i32
  }
  func.func @transform_4(%arg0: i32) -> (i32, i32) {
    %c0_i32 = arith.constant 0 : i32
    %c0_i32_0 = arith.constant 0 : i32
    %c0_i32_1 = arith.constant 0 : i32
    return %c0_i32, %c0_i32_0 : i32, i32
  }
  func.func @transform_5(%arg0: i32) -> (i32, i32) {
    %c0_i32 = arith.constant 0 : i32
    %c0_i32_0 = arith.constant 0 : i32
    %c0_i32_1 = arith.constant 0 : i32
    return %c0_i32, %c0_i32_0 : i32, i32
  }
  func.func @transform_6(%arg0: i32) -> (i32, i32) {
    %c0_i32 = arith.constant 0 : i32
    %c0_i32_0 = arith.constant 0 : i32
    %c0_i32_1 = arith.constant 0 : i32
    return %c0_i32, %c0_i32_0 : i32, i32
  }
  func.func @transform_7(%arg0: i32) -> (i32, i32) {
    %c0_i32 = arith.constant 0 : i32
    %c0_i32_0 = arith.constant 0 : i32
    return %arg0, %c0_i32 : i32, i32
  }
}

</mosaic_0001>

<bundles_post_ra>
// kernel: tpu_custom_call.1
= control target key start
LH: loop header
LB: loop body
LE: loop exit
PB: predicated region body
PF: predicated region fallthrough
CT: control target
= control target key end

     0   :  { %vm157_vm0 = vcmask 130048   ;;  %v36_v2 = vlaneseq  ;;  %s922_s28 = smov 16   ;;  %vm166_vm1 = vcmask 122880   ;;  %v923_v9 = vmov 0.0   ;;  %s924_s22 = smov 32   ;;  %s1159_s0 = inlined_call_operand.vmem [shape: f32[64,16], index: 0, kind: input, shape index: {}]   ;;  %s1160_s1 = inlined_call_operand.vmem [shape: bf16[48,16], index: 1, kind: input, shape index: {}]   ;;  %s1161_s2 = inlined_call_operand.vmem [shape: f32[1,16], index: 2, kind: input, shape index: {}]   ;;  %s1162_s3 = inlined_call_operand.vmem [shape: bf16[48,8], index: 3, kind: input, shape index: {}]   ;;  %s1163_s4 = inlined_call_operand.vmem [shape: f32[1,8], index: 4, kind: input, shape index: {}]   ;;  %s1164_s5 = inlined_call_operand.vmem [shape: bf16[64,128], index: 5, kind: input, shape index: {}]   ;;  %s1165_s6 = inlined_call_operand.vmem [shape: f32[1,128], index: 6, kind: input, shape index: {}]   ;;  %s1166_s7 = inlined_call_operand.hbm [shape: f32[2,128], index: 7, kind: output, shape index: {}]  }
   0x1   :  { %v30_v0 = vld [vmem:[%s1159_s0 + $0x10] sm:$0xff]  ;;  %v28_v1 = vld [vmem:[%s1159_s0] sm:$0xff]  ;;  %v29_v3 = vld [vmem:[%s1159_s0 + $0x8] sm:$0xff]  ;;  %167 = vst.msk [vmem:[#allocation2 + $0x1] sm:$0x1] %vm166_vm1, %v923_v9 }
   0x2   :  { %180 = vrot.lane.b32.xlu1 %v30_v0, %s922_s28  ;;  %160 = vst.msk [vmem:[#allocation2 + $0x12] sm:$0xff] %vm157_vm0, %v30_v0  ;;  %176 = vrot.lane.b32.xlu0 %v28_v1, %s922_s28  ;;  %158 = vst.msk [vmem:[#allocation2 + $0x2] sm:$0xff] %vm157_vm0, %v28_v1  ;;  %v32_v4 = vld [vmem:[%s1159_s0 + $0x20] sm:$0xff]  ;;  %v31_v5 = vld [vmem:[%s1159_s0 + $0x18] sm:$0xff]  ;;  %v991_v6 = vshrl.u32 %v36_v2, 7 }
   0x3   :  { %159 = vst.msk [vmem:[#allocation2 + $0xa] sm:$0xff] %vm157_vm0, %v29_v3  ;;  %162 = vst.msk [vmem:[#allocation2 + $0x22] sm:$0xff] %vm157_vm0, %v32_v4  ;;  %v33_v7 = vld [vmem:[%s1159_s0 + $0x28] sm:$0xff]  ;;  %v34_v8 = vld [vmem:[%s1159_s0 + $0x30] sm:$0xff] }
   0x4   :  { %484 = vst.msk [vmem:[#allocation4 + $0x1] sm:$0x1] %vm166_vm1, %v923_v9  ;;  %v888_v10 = vld [vmem:[%s1160_s1] sm:$0xff]   ;;  %v1009_v11 = vadd.s32 24, %v991_v6  ;;  %v49_v12 = vand.u32 31, %v991_v6  ;;  %v41_v13 = vadd.s32 32, %v991_v6 }
   0x5   :  { %163 = vst.msk [vmem:[#allocation2 + $0x2a] sm:$0xff] %vm157_vm0, %v33_v7  ;;  %164 = vst.msk [vmem:[#allocation2 + $0x32] sm:$0xff] %vm157_vm0, %v34_v8  ;;  %v44_v14 = vadd.s32 56, %v991_v6  ;;  %v889_v15 = vld [vmem:[%s1160_s1 + $0x8] sm:$0xff]   ;;  %842 = vmatprep.subr.bf16.mxu0 %v888_v10  ;;  %v890_v20 = vld [vmem:[%s1160_s1 + $0x10] sm:$0xff]  }
   0x6   :  { %182 = vrot.lane.b32.xlu1 %v31_v5, %s922_s28  ;;  %178 = vrot.lane.b32.xlu0 %v29_v3, %s922_s28  ;;  %v70_v16 = vand.u32 31, %v1009_v11  ;;  %vm209_vm2 = vcmp.eq.s32.totalorder %v49_v12, 0  ;;  %v77_v17 = vand.u32 31, %v41_v13  ;;  %v35_v22 = vld [vmem:[%s1159_s0 + $0x38] sm:$0xff] }
   0x7   :  { %v217_v18 = vsel %vm209_vm2, 0.0, %v28_v1  ;;  %v98_v19 = vand.u32 31, %v44_v14  ;;  %843 = vmatpush3.bf16.msra.mxu0 %v888_v10 }
   0x8   :  { %vm144_vm3 = vcmp.eq.s32.totalorder %v70_v16, 31  ;;  %844 = vmatprep.subr.bf16.mxu0 %v889_v15  ;;  %vm213_vm5 = vcmp.eq.s32.totalorder %v77_v17, 0 }
   0x9   :  { %v152_v21 = vsel %vm144_vm3, 0.0, %v31_v5  ;;  %vm148_vm4 = vcmp.eq.s32.totalorder %v98_v19, 31  ;;  %v221_v24 = vsel %vm213_vm5, 0.0, %v32_v4 }
   0xa   :  { %184 = vrot.lane.b32.xlu0 %v32_v4, %s922_s28  ;;  %233 = vrot.lane.b32.xlu1 %v217_v18, %s924_s22  ;;  %161 = vst.msk [vmem:[#allocation2 + $0x1a] sm:$0xff] %vm157_vm0, %v152_v21  ;;  %v156_v23 = vsel %vm148_vm4, 0.0, %v35_v22 }
   0xb   :  { %165 = vst.msk [vmem:[#allocation2 + $0x3a] sm:$0xff] %vm157_vm0, %v156_v23  ;;  %845 = vmatpush3.bf16.msra.mxu0 %v889_v15 }
   0xc   :  { %846 = vmatprep.subr.bf16.mxu0 %v890_v20 }
   0xe   :  { %235 = vrot.lane.b32.xlu0 %v29_v3, %s924_s22  ;;  %237 = vrot.lane.b32.xlu1 %v30_v0, %s924_s22 }
   0xf   :  { %12 = vsyncpa [#allocation9], 0  ;;  %847 = vmatpush3.bf16.msra.mxu0 %v890_v20  ;;  %vm200_vm6 = vcmask 261248   ;;  %vm257_vm7 = vcmask 392448   ;;  %vm311_vm8 = vcmask 392192   ;;  %vm266_vm9 = vcmask 385280  }
  0x10   :  { %866 = vmatprep.subr.bf16.mxu0 %v923_v9  ;;  %v805_v53 = vld [vmem:[%s1161_s2] ss:$0 sm:$0xff]  ;;  %v38_v2 = vadd.s32 8, %v991_v6  ;;  %vm630_vm14 = vcmask 64512   ;;  %s925_s12 = smov 8   ;;  %vm647_vm15 = vcmask 58368  }
  0x11   :  { %v894_v13 = vld [vmem:[%s1164_s5] sm:$0xff]   ;;  %s926_s15 = smov 24   ;;  %s929_s18 = smov 40   ;;  %vm655_vm1 = vcmask 123968   ;;  %vm663_vm2 = vcmask 189568   ;;  %vm671_vm3 = vcmask 255168  }
  0x12   :  { %239 = vrot.lane.b32.xlu0 %v31_v5, %s924_s22  ;;  %241 = vrot.lane.b32.xlu1 %v221_v24, %s924_s22  ;;  %v435_v3 = vand.u32 15, %v38_v2  ;;  %v428_v5 = vand.u32 15, %v991_v6  ;;  %s930_s19 = smov 56   ;;  %vm679_vm4 = vcmask 320768   ;;  %vm687_vm5 = vcmask 386368   ;;  %s931_s21 = smov [#allocation8]  }
  0x14   :  { %vm1072_vm10 = vcmp.eq.s32.totalorder %v435_v3, 15  ;;  %vm505_vm11 = vcmp.eq.s32.totalorder %v428_v5, 0 }
  0x16   :  { %186 = vrot.lane.b32.xlu0 %v33_v7, %s922_s28  ;;  %188 = vrot.lane.b32.xlu1 %v34_v8, %s922_s28 }
  0x1a   :  { %190 = vrot.lane.b32.xlu0 %v35_v22, %s922_s28  ;;  %243 = vrot.lane.b32.xlu1 %v33_v7, %s924_s22 }
  0x1e   :  { %245 = vrot.lane.b32.xlu0 %v34_v8, %s924_s22  ;;  %247 = vrot.lane.b32.xlu1 %v35_v22, %s924_s22 }
  0x74   :  { %v181_v25 = vpop.permute.xlu1 %180  ;;  %v177_v26 = vpop.permute.xlu0 %176 }
  0x75   :  { %203 = vst.msk [vmem:[#allocation2 + $0x11] sm:$0xff] %vm200_vm6, %v181_v25  ;;  %201 = vst.msk [vmem:[#allocation2 + $0x1] sm:$0xff] %vm200_vm6, %v177_v26 }
  0x78   :  { %v183_v27 = vpop.permute.xlu1 %182  ;;  %v179_v28 = vpop.permute.xlu0 %178 }
  0x79   :  { %204 = vst.msk [vmem:[#allocation2 + $0x19] sm:$0xff] %vm200_vm6, %v183_v27  ;;  %202 = vst.msk [vmem:[#allocation2 + $0x9] sm:$0xff] %vm200_vm6, %v179_v28  ;;  %v891_v28 = vld [vmem:[%s1162_s3] sm:$0xff]  }
  0x7a   :  { %856 = vmatprep.subr.bf16.mxu1 %v891_v28 }
  0x7b   :  { %857 = vmatpush3.bf16.msra.mxu1 %v891_v28 }
  0x7c   :  { %v185_v29 = vpop.permute.xlu0 %184  ;;  %v234_v30 = vpop.permute.xlu1 %233 }
  0x7d   :  { %205 = vst.msk [vmem:[#allocation2 + $0x21] sm:$0xff] %vm200_vm6, %v185_v29 }
  0x7e   :  { %258 = vst.msk [vmem:[#allocation2] sm:$0xff] %vm257_vm7, %v234_v30  ;;  %v892_v30 = vld [vmem:[%s1162_s3 + $0x8] sm:$0xff]  }
  0x7f   :  { %858 = vmatprep.subr.bf16.mxu1 %v892_v30 }
  0x80   :  { %v236_v31 = vpop.permute.xlu0 %235  ;;  %v238_v32 = vpop.permute.xlu1 %237  ;;  %859 = vmatpush3.bf16.msra.mxu1 %v892_v30 }
  0x81   :  { %259 = vst.msk [vmem:[#allocation2 + $0x8] sm:$0xff] %vm257_vm7, %v236_v31  ;;  %260 = vst.msk [vmem:[#allocation2 + $0x10] sm:$0xff] %vm257_vm7, %v238_v32  ;;  %v449_v31 = vand.u32 15, %v1009_v11  ;;  %v39_v32 = vadd.s32 16, %v991_v6 }
  0x83   :  { %vm475_vm12 = vcmp.eq.s32.totalorder %v449_v31, 15 }
  0x84   :  { %v240_v33 = vpop.permute.xlu0 %239  ;;  %v242_v34 = vpop.permute.xlu1 %241 }
  0x85   :  { %261 = vst.msk [vmem:[#allocation2 + $0x18] sm:$0xff] %vm257_vm7, %v240_v33  ;;  %262 = vst.msk [vmem:[#allocation2 + $0x20] sm:$0xff] %vm257_vm7, %v242_v34  ;;  %v893_v33 = vld [vmem:[%s1162_s3 + $0x10] sm:$0xff]  }
  0x86   :  { %860 = vmatprep.subr.bf16.mxu1 %v893_v33 }
  0x87   :  { %861 = vmatpush3.bf16.msra.mxu1 %v893_v33  ;;  %v819_v33 = vld [vmem:[%s1165_s6] ss:$0 sm:$0xff] }
  0x88   :  { %v187_v35 = vpop.permute.xlu0 %186  ;;  %v189_v36 = vpop.permute.xlu1 %188  ;;  %v268_v37 = vld [vmem:[#allocation2 + $0x1] sm:$0xff]  ;;  %v269_v38 = vld [vmem:[#allocation2 + $0x9] sm:$0xff] }
  0x89   :  { %206 = vst.msk [vmem:[#allocation2 + $0x29] sm:$0xff] %vm200_vm6, %v187_v35  ;;  %207 = vst.msk [vmem:[#allocation2 + $0x31] sm:$0xff] %vm200_vm6, %v189_v36  ;;  %v276_v39 = vpack.c.bf16 %v269_v38, %v268_v37  ;;  %v442_v36 = vand.u32 15, %v39_v32 }
  0x8b   :  { %848 = vmatprep.mubr.msk.bf16.mxu0 %vm311_vm8, %v276_v39  ;;  %vm507_vm13 = vcmp.eq.s32.totalorder %v442_v36, 0 }
  0x8c   :  { %v191_v40 = vpop.permute.xlu0 %190  ;;  %v244_v41 = vpop.permute.xlu1 %243  ;;  %v270_v42 = vld [vmem:[#allocation2 + $0x11] sm:$0xff]  ;;  %v271_v43 = vld [vmem:[#allocation2 + $0x19] sm:$0xff] }
  0x8d   :  { %208 = vst.msk [vmem:[#allocation2 + $0x39] sm:$0xff] %vm200_vm6, %v191_v40  ;;  %v277_v44 = vpack.c.bf16 %v271_v43, %v270_v42 }
  0x8e   :  { %263 = vst.msk [vmem:[#allocation2 + $0x28] sm:$0xff] %vm257_vm7, %v244_v41 }
  0x8f   :  { %267 = vst.msk [vmem:[#allocation2 + $0x40] sm:$0x1] %vm266_vm9, %v923_v9  ;;  %849 = vmatmul.mubr.msk.bf16.vlgmr.msra.gmra.mrb[0].mxu0 %vm311_vm8, %v277_v44 }
  0x90   :  { %v246_v45 = vpop.permute.xlu0 %245  ;;  %v248_v46 = vpop.permute.xlu1 %247  ;;  %867 = vmatpush3.bf16.msra.mxu0 %v894_v13 }
  0x91   :  { %264 = vst.msk [vmem:[#allocation2 + $0x30] sm:$0xff] %vm257_vm7, %v246_v45  ;;  %265 = vst.msk [vmem:[#allocation2 + $0x38] sm:$0xff] %vm257_vm7, %v248_v46  ;;  %868 = vmatprep.subr.bf16.mxu0 %v923_v9 }
  0x95   :  { %v272_v47 = vld [vmem:[#allocation2 + $0x21] sm:$0xff] }
  0x98   :  { %v273_v48 = vld [vmem:[#allocation2 + $0x29] sm:$0xff]  ;;  %v274_v49 = vld [vmem:[#allocation2 + $0x31] sm:$0xff]  ;;  %v275_v50 = vld [vmem:[#allocation2 + $0x39] sm:$0xff] }
  0x99   :  { %v278_v51 = vpack.c.bf16 %v273_v48, %v272_v47  ;;  %v279_v52 = vpack.c.bf16 %v275_v50, %v274_v49 }
  0x9b   :  { %852 = vmatprep.mubr.msk.bf16.mxu0 %vm311_vm8, %v278_v51 }
  0x9c   :  { %853 = vmatmul.mubr.msk.bf16.gmra.mrb[4].mxu0 %vm311_vm8, %v279_v52 }
 0x162   :  { %v850_v54 = vpop.f32.mrb[0].mxu0 }
 0x163   :  { %v367_v55 = vadd.f32 %v850_v54, %v805_v53  ;;  %v358_v56 = vpop.f32.mrb[1].mxu0 }
 0x164   :  { %v359_v57 = vadd.f32 %v805_v53, %v358_v56  ;;  %v851_v58 = vpop.f32.mrb[2].mxu0 }
 0x165   :  { %v391_v59 = vmax.f32 %v367_v55, 0.0  ;;  %v370_v60 = vadd.f32 %v851_v58, %v805_v53  ;;  %v361_v61 = vpop.f32.mrb[3].mxu0  ;;  %v813_v55 = vld [vmem:[%s1163_s4] ss:$0 sm:$0xff] }
 0x166   :  { %v389_v62 = vmax.f32 %v359_v57, 0.0  ;;  %v362_v63 = vadd.f32 %v805_v53, %v361_v61 }
 0x167   :  { %399 = vst.msk [vmem:[#allocation3 + $0x10] sm:$0xff] %vm157_vm0, %v391_v59  ;;  %v392_v0 = vmax.f32 %v370_v60, 0.0 }
 0x168   :  { %397 = vst.msk [vmem:[#allocation3] sm:$0xff] %vm157_vm0, %v389_v62  ;;  %v390_v1 = vmax.f32 %v362_v63, 0.0 }
 0x169   :  { %400 = vst.msk [vmem:[#allocation3 + $0x18] sm:$0xff] %vm157_vm0, %v392_v0 }
 0x16a   :  { %398 = vst.msk [vmem:[#allocation3 + $0x8] sm:$0xff] %vm157_vm0, %v390_v1 }
 0x16f   :  { %v854_v4 = vpop.f32.mrb[4].mxu0 }
 0x170   :  { %v383_v7 = vadd.f32 %v854_v4, %v805_v53  ;;  %v374_v8 = vpop.f32.mrb[5].mxu0  ;;  %v407_v10 = vld [vmem:[#allocation3 + $0x10] ss:$2 sm:$0xff]  ;;  %v415_v12 = vld [vmem:[#allocation3 + $0x11] ss:$2 sm:$0xff] }
 0x171   :  { %v375_v14 = vadd.f32 %v805_v53, %v374_v8  ;;  %v855_v15 = vpop.f32.mrb[6].mxu0  ;;  %v421_v16 = vmax.f32 %v407_v10, %v415_v12  ;;  %v405_v17 = vld [vmem:[#allocation3] ss:$2 sm:$0xff]  ;;  %v413_v18 = vld [vmem:[#allocation3 + $0x1] ss:$2 sm:$0xff] }
 0x172   :  { %v395_v19 = vmax.f32 %v383_v7, 0.0  ;;  %v386_v20 = vadd.f32 %v855_v15, %v805_v53  ;;  %v377_v21 = vpop.f32.mrb[7].mxu0  ;;  %v420_v22 = vmax.f32 %v405_v17, %v413_v18 }
 0x173   :  { %v393_v23 = vmax.f32 %v375_v14, 0.0  ;;  %v378_v24 = vadd.f32 %v805_v53, %v377_v21  ;;  %491 = vrot.lane.b32.xlu1 %v421_v16, %s922_s28  ;;  %v477_v25 = vsel %vm1072_vm10, 0.0, %v421_v16  ;;  %v895_v14 = vld [vmem:[%s1164_s5 + $0x8] sm:$0xff]   ;;  %v897_v21 = vld [vmem:[%s1164_s5 + $0x18] sm:$0xff]  }
 0x174   :  { %403 = vst.msk [vmem:[#allocation3 + $0x30] sm:$0xff] %vm157_vm0, %v395_v19  ;;  %v396_v26 = vmax.f32 %v386_v20, 0.0  ;;  %489 = vrot.lane.b32.xlu0 %v420_v22, %s922_s28  ;;  %480 = vst.msk [vmem:[#allocation4 + $0x2] sm:$0xff] %vm157_vm0, %v420_v22  ;;  %v509_v29 = vsel %vm505_vm11, 0.0, %v420_v22  ;;  %869 = vmatpush3.bf16.msra.mxu0 %v895_v14  ;;  %v896_v20 = vld [vmem:[%s1164_s5 + $0x10] sm:$0xff]  }
 0x175   :  { %481 = vst.msk [vmem:[#allocation4 + $0xa] sm:$0xff] %vm157_vm0, %v477_v25  ;;  %401 = vst.msk [vmem:[#allocation3 + $0x20] sm:$0xff] %vm157_vm0, %v393_v23  ;;  %v394_v27 = vmax.f32 %v378_v24, 0.0  ;;  %870 = vmatprep.subr.bf16.mxu0 %v923_v9 }
 0x176   :  { %404 = vst.msk [vmem:[#allocation3 + $0x38] sm:$0xff] %vm157_vm0, %v396_v26 }
 0x177   :  { %402 = vst.msk [vmem:[#allocation3 + $0x28] sm:$0xff] %vm157_vm0, %v394_v27  ;;  %519 = vrot.lane.b32.xlu1 %v421_v16, %s924_s22 }
 0x178   :  { %517 = vrot.lane.b32.xlu0 %v509_v29, %s924_s22  ;;  %871 = vmatpush3.bf16.msra.mxu0 %v896_v20 }
 0x179   :  { %872 = vmatprep.subr.bf16.mxu0 %v923_v9 }
 0x17c   :  { %873 = vmatpush3.bf16.msra.mxu0 %v897_v21 }
 0x17d   :  { %v411_v34 = vld [vmem:[#allocation3 + $0x30] ss:$2 sm:$0xff]  ;;  %v419_v35 = vld [vmem:[#allocation3 + $0x31] ss:$2 sm:$0xff] }
 0x17e   :  { %v423_v37 = vmax.f32 %v411_v34, %v419_v35  ;;  %v409_v38 = vld [vmem:[#allocation3 + $0x20] ss:$2 sm:$0xff]  ;;  %v417_v39 = vld [vmem:[#allocation3 + $0x21] ss:$2 sm:$0xff] }
 0x17f   :  { %v422_v40 = vmax.f32 %v409_v38, %v417_v39 }
 0x180   :  { %495 = vrot.lane.b32.xlu1 %v423_v37, %s922_s28  ;;  %v479_v11 = vsel %vm475_vm12, 0.0, %v423_v37 }
 0x181   :  { %493 = vrot.lane.b32.xlu0 %v422_v40, %s922_s28  ;;  %482 = vst.msk [vmem:[#allocation4 + $0x12] sm:$0xff] %vm157_vm0, %v422_v40  ;;  %483 = vst.msk [vmem:[#allocation4 + $0x1a] sm:$0xff] %vm157_vm0, %v479_v11  ;;  %v511_v6 = vsel %vm507_vm13, 0.0, %v422_v40  ;;  %vm927_vm0 = vmmov 0  }
 0x182   :  { %874 = vmatprep.mubr.msk.bf16.mxu0 %vm927_vm0, %v923_v9 }
 0x184   :  { %523 = vrot.lane.b32.xlu1 %v423_v37, %s924_s22 }
 0x185   :  { %521 = vrot.lane.b32.xlu0 %v511_v6, %s924_s22 }
 0x1e5   :  { %v492_v41 = vpop.permute.xlu1 %491 }
 0x1e6   :  { %502 = vst.msk [vmem:[#allocation4 + $0x9] sm:$0xff] %vm200_vm6, %v492_v41  ;;  %v490_v42 = vpop.permute.xlu0 %489 }
 0x1e7   :  { %501 = vst.msk [vmem:[#allocation4 + $0x1] sm:$0xff] %vm200_vm6, %v490_v42 }
 0x1e9   :  { %v520_v43 = vpop.permute.xlu1 %519 }
 0x1ea   :  { %530 = vst.msk [vmem:[#allocation4 + $0x8] sm:$0xff] %vm257_vm7, %v520_v43  ;;  %v518_v44 = vpop.permute.xlu0 %517 }
 0x1eb   :  { %529 = vst.msk [vmem:[#allocation4] sm:$0xff] %vm257_vm7, %v518_v44 }
 0x1f2   :  { %v496_v45 = vpop.permute.xlu1 %495  ;;  %v534_v50 = vld [vmem:[#allocation4 + $0x1] sm:$0xff] }
 0x1f3   :  { %504 = vst.msk [vmem:[#allocation4 + $0x19] sm:$0xff] %vm200_vm6, %v496_v45  ;;  %v494_v46 = vpop.permute.xlu0 %493 }
 0x1f4   :  { %533 = vst.msk [vmem:[#allocation4 + $0x20] sm:$0x1] %vm266_vm9, %v923_v9 }
 0x1f5   :  { %503 = vst.msk [vmem:[#allocation4 + $0x11] sm:$0xff] %vm200_vm6, %v494_v46  ;;  %vm695_vm6 = vcmask 451968  }
 0x1f6   :  { %v524_v47 = vpop.permute.xlu1 %523 }
 0x1f7   :  { %532 = vst.msk [vmem:[#allocation4 + $0x18] sm:$0xff] %vm257_vm7, %v524_v47  ;;  %v522_v48 = vpop.permute.xlu0 %521 }
 0x1f8   :  { %531 = vst.msk [vmem:[#allocation4 + $0x10] sm:$0xff] %vm257_vm7, %v522_v48  ;;  %vm703_vm7 = vcmask 517568  }
 0x1fe   :  { %v537_v49 = vld [vmem:[#allocation4 + $0x19] sm:$0xff] }
 0x1ff   :  { %v535_v51 = vld [vmem:[#allocation4 + $0x9] sm:$0xff]  ;;  %v536_v52 = vld [vmem:[#allocation4 + $0x11] sm:$0xff] }
 0x200   :  { %v538_v53 = vpack.c.bf16 %v535_v51, %v534_v50  ;;  %v539_v54 = vpack.c.bf16 %v537_v49, %v536_v52 }
 0x202   :  { %862 = vmatprep.mubr.msk.bf16.mxu1 %vm311_vm8, %v538_v53 }
 0x203   :  { %863 = vmatmul.mubr.msk.bf16.vlgmr.msra.gmra.mrb[0].mxu1 %vm311_vm8, %v539_v54  ;;  %vm746_vm8 = vcmask 523264  }
 0x2d6   :  { %v864_v56 = vpop.f32.mrb[0].mxu1 }
 0x2d7   :  { %v620_v57 = vadd.f32 %v864_v56, %v813_v55  ;;  %v611_v58 = vpop.f32.mrb[1].mxu1 }
 0x2d8   :  { %v612_v59 = vadd.f32 %v813_v55, %v611_v58  ;;  %v865_v60 = vpop.f32.mrb[2].mxu1 }
 0x2d9   :  { %v628_v61 = vmax.f32 %v620_v57, 0.0  ;;  %v623_v62 = vadd.f32 %v865_v60, %v813_v55  ;;  %v614_v63 = vpop.f32.mrb[3].mxu1 }
 0x2da   :  { %v626_v0 = vmax.f32 %v612_v59, 0.0  ;;  %v615_v1 = vadd.f32 %v813_v55, %v614_v63 }
 0x2db   :  { %633 = vst.msk [vmem:[#allocation5 + $0x10] sm:$0xff] %vm630_vm14, %v628_v61  ;;  %v629_v2 = vmax.f32 %v623_v62, 0.0 }
 0x2dc   :  { %631 = vst.msk [vmem:[#allocation5] sm:$0xff] %vm630_vm14, %v626_v0  ;;  %v627_v3 = vmax.f32 %v615_v1, 0.0 }
 0x2dd   :  { %634 = vst.msk [vmem:[#allocation5 + $0x18] sm:$0xff] %vm630_vm14, %v629_v2 }
 0x2de   :  { %632 = vst.msk [vmem:[#allocation5 + $0x8] sm:$0xff] %vm630_vm14, %v627_v3 }
 0x2e4   :  { %v637_v4 = vld [vmem:[#allocation5 + $0x10] ss:$2 sm:$0xff]  ;;  %v641_v5 = vld [vmem:[#allocation5 + $0x11] ss:$2 sm:$0xff] }
 0x2e5   :  { %v635_v7 = vld [vmem:[#allocation5] ss:$2 sm:$0xff]  ;;  %v639_v8 = vld [vmem:[#allocation5 + $0x1] ss:$2 sm:$0xff]  ;;  %v643_v10 = vmax.f32 %v637_v4, %v641_v5 }
 0x2e6   :  { %v642_v12 = vmax.f32 %v635_v7, %v639_v8 }
 0x2e7   :  { %645 = vst.msk [vmem:[#allocation6 + $0x8] sm:$0xff] %vm630_vm14, %v643_v10 }
 0x2e8   :  { %644 = vst.msk [vmem:[#allocation6] sm:$0xff] %vm630_vm14, %v642_v12 }
 0x2ef   :  { %v658_v15 = vld [vmem:[#allocation6 + $0x2] ss:$8 sm:$0x3]  ;;  %v650_v16 = vld [vmem:[#allocation6 + $0x1] ss:$8 sm:$0x3] }
 0x2f0   :  { %660 = vrot.lane.b32.xlu1 %v658_v15, %s922_s28  ;;  %652 = vrot.lane.b32.xlu0 %v650_v16, %s925_s12  ;;  %v674_v17 = vld [vmem:[#allocation6 + $0x4] ss:$8 sm:$0x3]  ;;  %v646_v18 = vld [vmem:[#allocation6] ss:$8 sm:$0x3] }
 0x2f1   :  { %v666_v19 = vld [vmem:[#allocation6 + $0x3] ss:$8 sm:$0x3]  ;;  %648 = vst.msk [vmem:[#allocation7] sm:$0x3] %vm647_vm15, %v646_v18  ;;  %s928_s28 = smov 48  }
 0x2f2   :  { %v690_v22 = vld [vmem:[#allocation6 + $0x6] ss:$8 sm:$0x3]  ;;  %v682_v23 = vld [vmem:[#allocation6 + $0x5] ss:$8 sm:$0x3] }
 0x2f3   :  { %v698_v24 = vld [vmem:[#allocation6 + $0x7] ss:$8 sm:$0x3] }
 0x2f4   :  { %676 = vrot.lane.b32.xlu1 %v674_v17, %s924_s22  ;;  %668 = vrot.lane.b32.xlu0 %v666_v19, %s926_s15  ;;  %s797_s22 = sshll.u32 %s931_s21, 4  ;;  %s798_s22 = int_to_ptr.vmem [resolvable:$true] %s797_s22 }
 0x2f5   :  { %s898_s23 = scalar_lea.vmem %s798_s22, 32  ;;  %p903_p1 = scmp.lt.s32.totalorder %s798_s22, %s798_s22 }
 0x2f6   :  { %p899_p0 = scmp.ne.s32.totalorder %s798_s22, %s898_s23  ;;  %p904_p2 = scmp.lt.s32.totalorder %s898_s23, %s898_s23 }
 0x2f8   :  { %692 = vrot.lane.b32.xlu1 %v690_v22, %s928_s28  ;;  %684 = vrot.lane.b32.xlu0 %v682_v23, %s929_s18  ;;  %p905_p3 = por %p904_p2, %p903_p1 }
 0x2fa   :  { %p906_p4 = pnand %p905_p3, %p899_p0 }
 0x2fc   :  { %700 = vrot.lane.b32.xlu0 %v698_v24, %s930_s19 }
 0x362   :  { %v661_v25 = vpop.permute.xlu1 %660  ;;  %v653_v26 = vpop.permute.xlu0 %652 }
 0x363   :  { %656 = vst.msk [vmem:[#allocation7] sm:$0x3] %vm655_vm1, %v653_v26 }
 0x364   :  { %664 = vst.msk [vmem:[#allocation7] sm:$0x3] %vm663_vm2, %v661_v25 }
 0x366   :  { %v677_v27 = vpop.permute.xlu1 %676  ;;  %v669_v9 = vpop.permute.xlu0 %668 }
 0x367   :  { %672 = vst.msk [vmem:[#allocation7] sm:$0x3] %vm671_vm3, %v669_v9 }
 0x368   :  { %680 = vst.msk [vmem:[#allocation7] sm:$0x3] %vm679_vm4, %v677_v27 }
 0x36a   :  { %v693_v28 = vpop.permute.xlu1 %692  ;;  %v685_v29 = vpop.permute.xlu0 %684 }
 0x36b   :  { %688 = vst.msk [vmem:[#allocation7] sm:$0x3] %vm687_vm5, %v685_v29 }
 0x36c   :  { %696 = vst.msk [vmem:[#allocation7] sm:$0x3] %vm695_vm6, %v693_v28 }
 0x36e   :  { %v701_v30 = vpop.permute.xlu0 %700 }
 0x36f   :  { %704 = vst.msk [vmem:[#allocation7] sm:$0x3] %vm703_vm7, %v701_v30 }
 0x376   :  { %v705_v31 = vld [vmem:[#allocation7] sm:$0x3] }
 0x377   :  { %v706_v32 = vpack.c.bf16 %v705_v31, %v705_v31 }
 0x379   :  { %875 = vmatmul.mubr.msk.bf16.vlgmr.msra.gmra.mrb[8].mxu0 %vm746_vm8, %v706_v32 }
 0x44c   :  { %v784_v34 = vpop.f32.mrb[8].mxu0 }
 0x44d   :  { %v785_v35 = vadd.f32 %v819_v33, %v784_v34  ;;  %v876_v36 = vpop.f32.mrb[9].mxu0 }
 0x44e   :  { %v787_v37 = vpop.f32.mrb[10].mxu0 }
 0x44f   :  { %790 = vst [vmem:[#allocation8] sm:$0x3] %v785_v35  ;;  %v877_v38 = vpop.f32.mrb[11].mxu0 }
 0x450   :  { %909 = shalt.err (!%p906_p4)
}
 0x451   :  { %s910_s6 = scalar_lea.hbm %s1166_s7, 32 }
 0x452   :  { %p911_p5 = scmp.ne.s32.totalorder %s1166_s7, %s910_s6  ;;  %p914_p6 = scmp.lt.u32.totalorder %s910_s6, %s1166_s7 }
 0x454   :  { %p916_p7 = pnand %p914_p6, %p911_p5 }
 0x456   :  { %919 = shalt.err (!%p916_p7)
}
 0x457   :  { %800 = dma.vmem_to_hbm [thread:$0]  %s798_s22, 32, %s1166_s7, [#allocation9]  }
 0x458   :  { %920 = dma.done.wait [#allocation9], 32  }
 0x459   :  { %921 = vsyncadd [#allocation9], 4294967264 }
 0x45a   :  { %804 = vsyncpa [#allocation9], 1 }

</bundles_post_ra>
